<compile_context>
chip_gen: v6e
topology: v6e:2x2x1
jax: 0.10.0
libtpu: 0.0.40
codegen_flags: <defaults>
</compile_context>

<pallas_src>
import copy
import functools
import threading
from typing import Any

import jax
import jax.numpy as jnp
from jax.experimental import pallas as pl
from jax.experimental.pallas import tpu as pltpu

LANE = 128            # vreg lane width; feature dims padded to this once at init.
                      # (For production-size dims on v6e/v7x, 256-aligned N tiles
                      #  feed the 2x256^2 MXU at full width — not worth it at demo sizes.)
BF16_TILE_ROWS = 16   # bf16 native packing is (16, 128): keep batch tiles 16-aligned
_VMEM_BUDGET = 48 << 20   # conservative working-set budget (v7x: 64 MiB physical / TC)


def _round_up(n: int, m: int) -> int:
    return (n + m - 1) // m * m


# ---------------------------------------------------------------------------
# Pallas kernel: fused Linear -> ReLU -> Linear (the wrapped model's forward)
# ---------------------------------------------------------------------------
def _mlp_kernel(x_ref, w1_ref, b1_ref, w2_ref, b2_ref, o_ref):
    # x:(TB, IN) f32   | w1:(IN, HID_P) bf16 | b1:(1, HID_P) f32
    # w2:(HID_P, OUT_P) bf16 | b2:(1, OUT_P) f32 | o:(TB, OUT_P) out_dtype
    x = x_ref[...].astype(w1_ref.dtype)        # in-kernel VPU cast (no wrapper HBM pass)
    h = jnp.dot(x, w1_ref[...], preferred_element_type=jnp.float32)
    h = jnp.maximum(h + b1_ref[...], 0.0)      # bias + ReLU in f32 (v5e-safe VPU path)
    y = jnp.dot(h.astype(w2_ref.dtype), w2_ref[...],
                preferred_element_type=jnp.float32)
    o_ref[...] = (y + b2_ref[...]).astype(o_ref.dtype)


@functools.partial(
    jax.jit,
    static_argnames=("out_features", "block_batch", "out_dtype", "single_buffer_weights"))
def _mlp_forward_impl(x, w1p, b1p, w2p, b2p, *, out_features, block_batch,
                      out_dtype, single_buffer_weights):
    batch, in_f = x.shape
    hid_p = w1p.shape[1]
    out_p = w2p.shape[1]
    out_itemsize = jnp.dtype(out_dtype).itemsize

    # ---- batch-tile selection (all static: shapes are compile-time constants) ----
    tb = min(block_batch, _round_up(batch, BF16_TILE_ROWS))
    # v7x megacore: a single grid step idles the 2nd TensorCore; split when batch allows.
    if batch > BF16_TILE_ROWS and _round_up(batch, tb) == tb:
        tb = _round_up((batch + 1) // 2, BF16_TILE_ROWS)

    weight_bufs = 1 if single_buffer_weights else 2
    weight_bytes = ((w1p.size + w2p.size) * w1p.dtype.itemsize
                    + (b1p.size + b2p.size) * b1p.dtype.itemsize)

    def footprint(t):
        x_bytes = 2 * t * in_f * x.dtype.itemsize      # double-buffered input tile
        o_bytes = 2 * t * out_p * out_itemsize         # double-buffered output tile
        h_bytes = t * hid_p * 4                        # f32 intermediate
        return weight_bufs * weight_bytes + x_bytes + o_bytes + h_bytes

    while tb > BF16_TILE_ROWS and footprint(tb) > _VMEM_BUDGET:
        tb = max(BF16_TILE_ROWS, _round_up(tb // 2, BF16_TILE_ROWS))

    batch_p = _round_up(batch, tb)
    grid = (batch_p // tb,)

    # Pad ONLY the batch axis, and only when needed; feature dims use full-extent
    # blocks (exempt from the (8,128) rule) so no padded activation copy per call.
    xp = x if batch_p == batch else jnp.pad(x, ((0, batch_p - batch), (0, 0)))

    def _resident(shape):
        # Constant index_map => operand stays VMEM-resident across all grid steps;
        # single-buffer it when the pipeline_mode knob is available.
        if single_buffer_weights:
            return pl.BlockSpec(shape, lambda i: (0, 0), pipeline_mode=pl.Buffered(1))
        return pl.BlockSpec(shape, lambda i: (0, 0))

    flops = 2 * batch_p * in_f * hid_p + 2 * batch_p * hid_p * out_p
    bytes_accessed = (xp.size * x.dtype.itemsize + weight_bytes
                      + batch_p * out_p * out_itemsize)
    vmem_limit = int(min(max(footprint(tb) + (8 << 20), 32 << 20), 56 << 20))

    # TODO(synk): if the wrapped model's weights outgrow the VMEM budget (notably on
    # v7x's 64 MiB VMEM), add K/N grid axes with an f32 scratch accumulator
    # (pl.when init/finalize) instead of keeping all weights resident.
    y_p = pl.pallas_call(
        _mlp_kernel,
        out_shape=jax.ShapeDtypeStruct((batch_p, out_p), out_dtype),
        grid_spec=pl.GridSpec(
            grid=grid,
            in_specs=[
                pl.BlockSpec((tb, in_f), lambda i: (i, 0)),   # x: batch-tiled stream
                _resident(w1p.shape),                         # w1: VMEM-resident
                _resident(b1p.shape),                         # b1
                _resident(w2p.shape),                         # w2
                _resident(b2p.shape),                         # b2
            ],
            out_specs=pl.BlockSpec((tb, out_p), lambda i: (i, 0)),
        ),
        compiler_params=pltpu.CompilerParams(
            dimension_semantics=("parallel",),       # megacore-shardable batch axis
            vmem_limit_bytes=vmem_limit,
        ),
        cost_estimate=pl.CostEstimate(
            flops=flops, transcendentals=0, bytes_accessed=bytes_accessed),
    )(xp, w1p, b1p, w2p, b2p)

    # Skip the slice entirely when everything is already tile-aligned.
    if batch_p == batch and out_p == out_features:
        return y_p
    # NOTE: padded batch rows of y_p equal the bias (not zero); they are dropped here.
    return y_p[:batch, :out_features]


# One-time runtime fallback: if this JAX build rejects pipeline_mode/Buffered(1),
# silently fall back to default double-buffered weights.
_SINGLE_BUFFER_STATE = {"enabled": hasattr(pl, "Buffered"), "verified": False}


def mlp_forward(x, w1p, b1p, w2p, b2p, *, out_features: int,
                block_batch: int = 512, out_dtype=jnp.bfloat16):
    """Fused MLP forward: batch-tiled grid, VMEM-resident pre-padded bf16 weights."""
    if _SINGLE_BUFFER_STATE["enabled"] and not _SINGLE_BUFFER_STATE["verified"]:
        try:
            out = _mlp_forward_impl(x, w1p, b1p, w2p, b2p, out_features=out_features,
                                    block_batch=block_batch, out_dtype=out_dtype,
                                    single_buffer_weights=True)
            jax.block_until_ready(out)
            _SINGLE_BUFFER_STATE["verified"] = True
            return out
        except Exception:
            _SINGLE_BUFFER_STATE["enabled"] = False
    return _mlp_forward_impl(x, w1p, b1p, w2p, b2p, out_features=out_features,
                             block_batch=block_batch, out_dtype=out_dtype,
                             single_buffer_weights=_SINGLE_BUFFER_STATE["enabled"])


# ---------------------------------------------------------------------------
# Wrapped "model": parameters + forward that dispatches to the Pallas kernel
# ---------------------------------------------------------------------------
class TinyMLP:
    """Stand-in for the generic `ModuleType` wrapped by ModelWrapper.

    Precision choice (documented): matmul operands are bf16 with f32 MXU
    accumulation; biases/ReLU in f32; output emitted in bf16.
    """

    def __init__(self, in_features: int, hidden: int, out_features: int, key) -> None:
        k1, k2, k3, k4 = jax.random.split(key, 4)
        self.in_features = in_features
        self.hidden = hidden
        self.out_features = out_features
        self.w1 = jax.random.normal(k1, (in_features, hidden), jnp.float32) * (1.0 / in_features) ** 0.5
        self.b1 = jax.random.normal(k2, (1, hidden), jnp.float32) * 0.01
        self.w2 = jax.random.normal(k3, (hidden, out_features), jnp.float32) * (1.0 / hidden) ** 0.5
        self.b2 = jax.random.normal(k4, (1, out_features), jnp.float32) * 0.01
        self.frozen = False  # analogue of requires_grad=False / eval()
        self._prepare_kernel_params()

    def _prepare_kernel_params(self) -> None:
        """Cast + pad weights to lane-dense kernel operands ONCE (not per call)."""
        hid_p = _round_up(self.hidden, LANE)
        out_p = _round_up(self.out_features, LANE)
        self.w1_p = (jnp.zeros((self.in_features, hid_p), jnp.bfloat16)
                     .at[:, :self.hidden].set(self.w1.astype(jnp.bfloat16)))
        self.b1_p = (jnp.zeros((1, hid_p), jnp.float32)
                     .at[:, :self.hidden].set(self.b1.astype(jnp.float32)))
        self.w2_p = (jnp.zeros((hid_p, out_p), jnp.bfloat16)
                     .at[:self.hidden, :self.out_features].set(self.w2.astype(jnp.bfloat16)))
        self.b2_p = (jnp.zeros((1, out_p), jnp.float32)
                     .at[:, :self.out_features].set(self.b2.astype(jnp.float32)))
        # NOTE: if raw weights are updated (training), call this again to refresh
        # the padded kernel operands.

    def parameters(self):
        return [self.w1, self.b1, self.w2, self.b2,
                self.w1_p, self.b1_p, self.w2_p, self.b2_p]

    def __call__(self, x):
        return mlp_forward(x, self.w1_p, self.b1_p, self.w2_p, self.b2_p,
                           out_features=self.out_features)


# ---------------------------------------------------------------------------
# ModelWrapper semantics (forward delegates; infer = device-move + forward)
# ---------------------------------------------------------------------------
def _maybe_to_device(a, device):
    # Skip device_put if the array is already resident on the target device.
    if isinstance(a, jax.Array) and device is not None and device not in a.devices():
        return jax.device_put(a, device)
    return a


def default_infer(wrapper: "ModelWrapper", *args: Any, **kwds: Any) -> Any:
    device = wrapper.device
    new_args = [_maybe_to_device(a, device) for a in args]
    new_kwds = {k: _maybe_to_device(v, device) for k, v in kwds.items()}
    return wrapper(*new_args, **new_kwds)


class ThreadSafeInferenceWrapper:
    def __init__(self, wrapper: "ModelWrapper") -> None:
        self._wrapper = wrapper
        self._lock = threading.RLock()

    @property
    def model(self):
        return self._wrapper.model

    @model.setter
    def model(self, m) -> None:
        with self._lock:
            self._wrapper.model = m

    def infer(self, *args: Any, **kwds: Any) -> Any:
        with self._lock:
            return self._wrapper.infer(*args, **kwds)

    def __call__(self, *args: Any, **kwds: Any) -> Any:
        return self.infer(*args, **kwds)


class ModelWrapper:
    def __init__(self, model, default_device=None, has_inference: bool = True,
                 inference_forward=default_infer, inference_thread_only: bool = False) -> None:
        self.model = model
        self._default_device = default_device if default_device is not None else jax.devices()[0]
        self.has_inference = has_inference
        if inference_thread_only and not has_inference:
            raise ValueError("`has_inference` is False but model is inference thread only!")
        self.inference_thread_only = inference_thread_only
        self._inference_forward = inference_forward
        self._inference_wrapper = None
        # TODO(synk): parameter_file checkpoint loading (torch.load) is intentionally omitted.

    def forward(self, *args: Any, **kwds: Any) -> Any:
        """Training-thread forward: pure delegation to the wrapped model."""
        return self.model(*args, **kwds)

    __call__ = forward

    @property
    def device(self):
        for param in self.model.parameters():
            return list(param.devices())[0]
        return self._default_device

    def infer(self, *args: Any, **kwds: Any) -> Any:
        return self._inference_forward(self, *args, **kwds)

    def to_default_device(self) -> None:
        for name in ("w1", "b1", "w2", "b2", "w1_p", "b1_p", "w2_p", "b2_p"):
            if hasattr(self.model, name):
                setattr(self.model, name,
                        jax.device_put(getattr(self.model, name), self._default_device))

    def freeze_model(self) -> None:
        self.model.frozen = True

    def unfreeze_model(self) -> None:
        self.model.frozen = False

    @property
    def inference_wrapper(self) -> ThreadSafeInferenceWrapper:
        if self._inference_wrapper is None:
            self._inference_wrapper = self._create_inference()
        return self._inference_wrapper

    def _create_inference(self) -> ThreadSafeInferenceWrapper:
        if self.has_inference:
            if self.inference_thread_only:
                copied_self = self
            else:
                # Snapshot the model (jax arrays are immutable, shallow copy suffices).
                copied_self = copy.copy(self)
                copied_self.model = copy.copy(self.model)
            copied_self.freeze_model()
            return ThreadSafeInferenceWrapper(copied_self)
        raise RuntimeError("The model has no inference component!")


# ---------------------------------------------------------------------------
# Demo / sanity check
# ---------------------------------------------------------------------------
if __name__ == "__main__":
    key = jax.random.PRNGKey(0)
    k_param, k_x, k_x2 = jax.random.split(key, 3)

    BATCH, IN_F, HIDDEN, OUT_F = 16, 32, 64, 32
    model = TinyMLP(IN_F, HIDDEN, OUT_F, k_param)
    wrapper = ModelWrapper(model)

    x = jax.random.normal(k_x, (BATCH, IN_F), jnp.float32)

    # training-thread path (forward) and inference-thread path (infer)
    y_train = wrapper(x)
    y_infer = wrapper.inference_wrapper(x)
    jax.block_until_ready((y_train, y_infer))

    # reference: same bf16-operand / f32-accumulate / bf16-output recipe in plain JAX
    def ref(xa, m):
        xb = xa.astype(jnp.bfloat16)
        h = jnp.maximum(jnp.dot(xb, m.w1.astype(jnp.bfloat16),
                                preferred_element_type=jnp.float32) + m.b1, 0.0)
        y = jnp.dot(h.astype(jnp.bfloat16), m.w2.astype(jnp.bfloat16),
                    preferred_element_type=jnp.float32) + m.b2
        return y.astype(jnp.bfloat16)

    y_ref = ref(x, model)
    assert y_train.shape == (BATCH, OUT_F)
    assert y_train.dtype == jnp.bfloat16
    assert jnp.allclose(y_train.astype(jnp.float32), y_ref.astype(jnp.float32),
                        atol=2e-2, rtol=2e-2), "mismatch vs reference"
    assert jnp.allclose(y_infer.astype(jnp.float32), y_ref.astype(jnp.float32),
                        atol=2e-2, rtol=2e-2), "infer path mismatch"

    # ragged batch: exercises the batch-only padding path
    x2 = jax.random.normal(k_x2, (10, IN_F), jnp.float32)
    y2 = wrapper(x2)
    jax.block_until_ready(y2)
    assert y2.shape == (10, OUT_F)
    assert jnp.allclose(y2.astype(jnp.float32), ref(x2, model).astype(jnp.float32),
                        atol=2e-2, rtol=2e-2), "ragged-batch mismatch"

    print("KERNEL_OK")
</pallas_src>

<mosaic_0001>
module attributes {stable_mosaic.version = 11 : i64} {
  func.func @_mlp_kernel(%arg0: i32, %arg1: memref<16x32xf32, #tpu.memory_space<vmem>>, %arg2: memref<32x128xbf16, #tpu.memory_space<vmem>>, %arg3: memref<1x128xf32, #tpu.memory_space<vmem>>, %arg4: memref<128x128xbf16, #tpu.memory_space<vmem>>, %arg5: memref<1x128xf32, #tpu.memory_space<vmem>>, %arg6: memref<16x128xbf16, #tpu.memory_space<vmem>>) attributes {dimension_semantics = [#tpu.dimension_semantics<parallel>], iteration_bounds = array<i64: 1>, scalar_prefetch = 0 : i64, scratch_operands = 0 : i64, tpu.core_type = #tpu.core_type<tc>, window_params = [{transform_indices = @transform_0, window_bounds = array<i64: 16, 32>}, {pipeline_mode = #tpu.pipeline_mode<synchronous>, transform_indices = @transform_1, window_bounds = array<i64: 32, 128>}, {pipeline_mode = #tpu.pipeline_mode<synchronous>, transform_indices = @transform_2, window_bounds = array<i64: 1, 128>}, {pipeline_mode = #tpu.pipeline_mode<synchronous>, transform_indices = @transform_3, window_bounds = array<i64: 128, 128>}, {pipeline_mode = #tpu.pipeline_mode<synchronous>, transform_indices = @transform_4, window_bounds = array<i64: 1, 128>}, {transform_indices = @transform_5, window_bounds = array<i64: 16, 128>}]} {
    %c0 = arith.constant 0 : index
    %c0_0 = arith.constant 0 : index
    %0 = vector.load %arg1[%c0, %c0_0] : memref<16x32xf32, #tpu.memory_space<vmem>>, vector<16x32xf32>
    %1 = arith.truncf %0 : vector<16x32xf32> to vector<16x32xbf16>
    %c0_1 = arith.constant 0 : index
    %c0_2 = arith.constant 0 : index
    %2 = vector.load %arg2[%c0_1, %c0_2] : memref<32x128xbf16, #tpu.memory_space<vmem>>, vector<32x128xbf16>
    %cst = arith.constant dense<0.000000e+00> : vector<16x128xf32>
    %3 = tpu.matmul %1, %2, %cst {dimension_numbers = #tpu.dot_dimension_numbers<[1], [0], [0], [1], [0, 0, 1, 1], [], []>} : vector<16x32xbf16>, vector<32x128xbf16>, vector<16x128xf32> -> vector<16x128xf32>
    %c0_3 = arith.constant 0 : index
    %c0_4 = arith.constant 0 : index
    %4 = vector.load %arg3[%c0_3, %c0_4] : memref<1x128xf32, #tpu.memory_space<vmem>>, vector<1x128xf32>
    %5 = vector.broadcast %4 : vector<1x128xf32> to vector<16x128xf32>
    %6 = arith.addf %3, %5 : vector<16x128xf32>
    %cst_5 = arith.constant 0.000000e+00 : f32
    %7 = vector.broadcast %cst_5 : f32 to vector<16x128xf32>
    %8 = arith.maximumf %6, %7 : vector<16x128xf32>
    %9 = arith.truncf %8 : vector<16x128xf32> to vector<16x128xbf16>
    %c0_6 = arith.constant 0 : index
    %c0_7 = arith.constant 0 : index
    %10 = vector.load %arg4[%c0_6, %c0_7] : memref<128x128xbf16, #tpu.memory_space<vmem>>, vector<128x128xbf16>
    %cst_8 = arith.constant dense<0.000000e+00> : vector<16x128xf32>
    %11 = tpu.matmul %9, %10, %cst_8 {dimension_numbers = #tpu.dot_dimension_numbers<[1], [0], [0], [1], [0, 0, 1, 1], [], []>} : vector<16x128xbf16>, vector<128x128xbf16>, vector<16x128xf32> -> vector<16x128xf32>
    %c0_9 = arith.constant 0 : index
    %c0_10 = arith.constant 0 : index
    %12 = vector.load %arg5[%c0_9, %c0_10] : memref<1x128xf32, #tpu.memory_space<vmem>>, vector<1x128xf32>
    %13 = vector.broadcast %12 : vector<1x128xf32> to vector<16x128xf32>
    %14 = arith.addf %11, %13 : vector<16x128xf32>
    %15 = arith.truncf %14 : vector<16x128xf32> to vector<16x128xbf16>
    %c0_11 = arith.constant 0 : index
    %c0_12 = arith.constant 0 : index
    %16 = vector.load %arg6[%c0_11, %c0_12] : memref<16x128xbf16, #tpu.memory_space<vmem>>, vector<16x128xbf16>
    tpu.vector_store %arg6[%c0_11, %c0_12], %15 {strides = array<i32>} : memref<16x128xbf16, #tpu.memory_space<vmem>>, vector<16x128xbf16>,
    return
  }
  func.func @transform_0(%arg0: i32) -> (i32, i32) {
    %c0_i32 = arith.constant 0 : i32
    %c0_i32_0 = arith.constant 0 : i32
    return %arg0, %c0_i32 : i32, i32
  }
  func.func @transform_1(%arg0: i32) -> (i32, i32) {
    %c0_i32 = arith.constant 0 : i32
    %c0_i32_0 = arith.constant 0 : i32
    %c0_i32_1 = arith.constant 0 : i32
    return %c0_i32, %c0_i32_0 : i32, i32
  }
  func.func @transform_2(%arg0: i32) -> (i32, i32) {
    %c0_i32 = arith.constant 0 : i32
    %c0_i32_0 = arith.constant 0 : i32
    %c0_i32_1 = arith.constant 0 : i32
    return %c0_i32, %c0_i32_0 : i32, i32
  }
  func.func @transform_3(%arg0: i32) -> (i32, i32) {
    %c0_i32 = arith.constant 0 : i32
    %c0_i32_0 = arith.constant 0 : i32
    %c0_i32_1 = arith.constant 0 : i32
    return %c0_i32, %c0_i32_0 : i32, i32
  }
  func.func @transform_4(%arg0: i32) -> (i32, i32) {
    %c0_i32 = arith.constant 0 : i32
    %c0_i32_0 = arith.constant 0 : i32
    %c0_i32_1 = arith.constant 0 : i32
    return %c0_i32, %c0_i32_0 : i32, i32
  }
  func.func @transform_5(%arg0: i32) -> (i32, i32) {
    %c0_i32 = arith.constant 0 : i32
    %c0_i32_0 = arith.constant 0 : i32
    return %arg0, %c0_i32 : i32, i32
  }
}

module attributes {stable_mosaic.version = 11 : i64} {
  func.func @_mlp_kernel(%arg0: i32, %arg1: memref<16x32xf32, #tpu.memory_space<vmem>>, %arg2: memref<32x128xbf16, #tpu.memory_space<vmem>>, %arg3: memref<1x128xf32, #tpu.memory_space<vmem>>, %arg4: memref<128x128xbf16, #tpu.memory_space<vmem>>, %arg5: memref<1x128xf32, #tpu.memory_space<vmem>>, %arg6: memref<16x128xbf16, #tpu.memory_space<vmem>>) attributes {dimension_semantics = [#tpu.dimension_semantics<parallel>], iteration_bounds = array<i64: 1>, scalar_prefetch = 0 : i64, scratch_operands = 0 : i64, tpu.core_type = #tpu.core_type<tc>, window_params = [{transform_indices = @transform_0, window_bounds = array<i64: 16, 32>}, {pipeline_mode = #tpu.pipeline_mode<synchronous>, transform_indices = @transform_1, window_bounds = array<i64: 32, 128>}, {pipeline_mode = #tpu.pipeline_mode<synchronous>, transform_indices = @transform_2, window_bounds = array<i64: 1, 128>}, {pipeline_mode = #tpu.pipeline_mode<synchronous>, transform_indices = @transform_3, window_bounds = array<i64: 128, 128>}, {pipeline_mode = #tpu.pipeline_mode<synchronous>, transform_indices = @transform_4, window_bounds = array<i64: 1, 128>}, {transform_indices = @transform_5, window_bounds = array<i64: 16, 128>}]} {
    %c0 = arith.constant 0 : index
    %c0_0 = arith.constant 0 : index
    %0 = vector.load %arg1[%c0, %c0_0] : memref<16x32xf32, #tpu.memory_space<vmem>>, vector<16x32xf32>
    %1 = arith.truncf %0 : vector<16x32xf32> to vector<16x32xbf16>
    %c0_1 = arith.constant 0 : index
    %c0_2 = arith.constant 0 : index
    %2 = vector.load %arg2[%c0_1, %c0_2] : memref<32x128xbf16, #tpu.memory_space<vmem>>, vector<32x128xbf16>
    %cst = arith.constant dense<0.000000e+00> : vector<16x128xf32>
    %3 = tpu.matmul %1, %2, %cst {dimension_numbers = #tpu.dot_dimension_numbers<[1], [0], [0], [1], [0, 0, 1, 1], [], []>} : vector<16x32xbf16>, vector<32x128xbf16>, vector<16x128xf32> -> vector<16x128xf32>
    %c0_3 = arith.constant 0 : index
    %c0_4 = arith.constant 0 : index
    %4 = vector.load %arg3[%c0_3, %c0_4] : memref<1x128xf32, #tpu.memory_space<vmem>>, vector<1x128xf32>
    %5 = vector.broadcast %4 : vector<1x128xf32> to vector<16x128xf32>
    %6 = arith.addf %3, %5 : vector<16x128xf32>
    %cst_5 = arith.constant 0.000000e+00 : f32
    %7 = vector.broadcast %cst_5 : f32 to vector<16x128xf32>
    %8 = arith.maximumf %6, %7 : vector<16x128xf32>
    %9 = arith.truncf %8 : vector<16x128xf32> to vector<16x128xbf16>
    %c0_6 = arith.constant 0 : index
    %c0_7 = arith.constant 0 : index
    %10 = vector.load %arg4[%c0_6, %c0_7] : memref<128x128xbf16, #tpu.memory_space<vmem>>, vector<128x128xbf16>
    %cst_8 = arith.constant dense<0.000000e+00> : vector<16x128xf32>
    %11 = tpu.matmul %9, %10, %cst_8 {dimension_numbers = #tpu.dot_dimension_numbers<[1], [0], [0], [1], [0, 0, 1, 1], [], []>} : vector<16x128xbf16>, vector<128x128xbf16>, vector<16x128xf32> -> vector<16x128xf32>
    %c0_9 = arith.constant 0 : index
    %c0_10 = arith.constant 0 : index
    %12 = vector.load %arg5[%c0_9, %c0_10] : memref<1x128xf32, #tpu.memory_space<vmem>>, vector<1x128xf32>
    %13 = vector.broadcast %12 : vector<1x128xf32> to vector<16x128xf32>
    %14 = arith.addf %11, %13 : vector<16x128xf32>
    %15 = arith.truncf %14 : vector<16x128xf32> to vector<16x128xbf16>
    %c0_11 = arith.constant 0 : index
    %c0_12 = arith.constant 0 : index
    %16 = vector.load %arg6[%c0_11, %c0_12] : memref<16x128xbf16, #tpu.memory_space<vmem>>, vector<16x128xbf16>
    tpu.vector_store %arg6[%c0_11, %c0_12], %15 {strides = array<i32>} : memref<16x128xbf16, #tpu.memory_space<vmem>>, vector<16x128xbf16>,
    return
  }
  func.func @transform_0(%arg0: i32) -> (i32, i32) {
    %c0_i32 = arith.constant 0 : i32
    %c0_i32_0 = arith.constant 0 : i32
    return %arg0, %c0_i32 : i32, i32
  }
  func.func @transform_1(%arg0: i32) -> (i32, i32) {
    %c0_i32 = arith.constant 0 : i32
    %c0_i32_0 = arith.constant 0 : i32
    %c0_i32_1 = arith.constant 0 : i32
    return %c0_i32, %c0_i32_0 : i32, i32
  }
  func.func @transform_2(%arg0: i32) -> (i32, i32) {
    %c0_i32 = arith.constant 0 : i32
    %c0_i32_0 = arith.constant 0 : i32
    %c0_i32_1 = arith.constant 0 : i32
    return %c0_i32, %c0_i32_0 : i32, i32
  }
  func.func @transform_3(%arg0: i32) -> (i32, i32) {
    %c0_i32 = arith.constant 0 : i32
    %c0_i32_0 = arith.constant 0 : i32
    %c0_i32_1 = arith.constant 0 : i32
    return %c0_i32, %c0_i32_0 : i32, i32
  }
  func.func @transform_4(%arg0: i32) -> (i32, i32) {
    %c0_i32 = arith.constant 0 : i32
    %c0_i32_0 = arith.constant 0 : i32
    %c0_i32_1 = arith.constant 0 : i32
    return %c0_i32, %c0_i32_0 : i32, i32
  }
  func.func @transform_5(%arg0: i32) -> (i32, i32) {
    %c0_i32 = arith.constant 0 : i32
    %c0_i32_0 = arith.constant 0 : i32
    return %arg0, %c0_i32 : i32, i32
  }
}

</mosaic_0001>

<bundles_post_ra>
// kernel: _mlp_forward_impl.1
= control target key start
LH: loop header
LB: loop body
LE: loop exit
PB: predicated region body
PF: predicated region fallthrough
CT: control target
= control target key end

     0   :  { %10 = vsyncpa [#allocation3], 0  ;;  %s512_s0 = inlined_call_operand.hbm [shape: f32[16,32], index: 0, kind: input, shape index: {}]   ;;  %s513_s1 = inlined_call_operand.hbm [shape: bf16[32,128], index: 1, kind: input, shape index: {}]   ;;  %s514_s2 = inlined_call_operand.vmem [shape: f32[1,128], index: 2, kind: input, shape index: {}]   ;;  %s515_s3 = inlined_call_operand.hbm [shape: bf16[128,128], index: 3, kind: input, shape index: {}]   ;;  %s516_s4 = inlined_call_operand.vmem [shape: f32[1,128], index: 4, kind: input, shape index: {}]   ;;  %s517_s5 = inlined_call_operand.hbm [shape: bf16[16,128], index: 5, kind: output, shape index: {}]  }
   0x1   :  { %11 = vsyncpa [#allocation6], 0 }
   0x2   :  { %12 = vsyncpa [#allocation4], 0  ;;  %s445_s18 = smov [#allocation5]  }
   0x3   :  { %s30_s19 = sshll.u32 %s445_s18, 4  ;;  %s31_s19 = int_to_ptr.vmem [resolvable:$true] %s30_s19 }
   0x4   :  { %s367_s20 = scalar_lea.vmem %s31_s19, 256  ;;  %p372_p1 = scmp.lt.s32.totalorder %s31_s19, %s31_s19 }
   0x5   :  { %p368_p0 = scmp.ne.s32.totalorder %s31_s19, %s367_s20  ;;  %p373_p2 = scmp.lt.s32.totalorder %s367_s20, %s367_s20 }
   0x7   :  { %p374_p3 = por %p373_p2, %p372_p1 }
   0x9   :  { %p375_p4 = pnand %p374_p3, %p368_p0 }
   0xb   :  { %378 = shalt.err (!%p375_p4)
}
   0xc   :  { %s446_s21 = smov 64   ;;  %s447_s22 = smov 4  }
   0xd   :  { %36 = dma.hbm_to_vmem [thread:$0]  %s513_s1, 256, %s31_s19, [#allocation6], %s446_s21, %s446_s21, %s447_s22  }
   0xe   :  { %s448_s25 = smov [#allocation2]  }
   0xf   :  { %s18_s26 = sshll.u32 %s448_s25, 4  ;;  %s19_s26 = int_to_ptr.vmem [resolvable:$true] %s18_s26 }
  0x10   :  { %s387_s27 = scalar_lea.vmem %s19_s26, 256  ;;  %p392_p6 = scmp.lt.s32.totalorder %s19_s26, %s19_s26 }
  0x11   :  { %p388_p5 = scmp.ne.s32.totalorder %s19_s26, %s387_s27  ;;  %p393_p7 = scmp.lt.s32.totalorder %s387_s27, %s387_s27 }
  0x13   :  { %p394_p8 = por %p393_p7, %p392_p6 }
  0x15   :  { %p395_p9 = pnand %p394_p8, %p388_p5 }
  0x17   :  { %398 = shalt.err (!%p395_p9)
}
  0x18   :  { %s449_s28 = smov 128   ;;  %s450_s29 = smov 8  }
  0x19   :  { %24 = dma.hbm_to_vmem [thread:$0]  %s512_s0, 256, %s19_s26, [#allocation3], %s449_s28, %s449_s28, %s450_s29  }
  0x1a   :  { %s451_s7 = smov [#allocation7]  }
  0x1b   :  { %s44_s8 = sshll.u32 %s451_s7, 4  ;;  %s45_s8 = int_to_ptr.vmem [resolvable:$true] %s44_s8 }
  0x1c   :  { %s407_s1 = scalar_lea.vmem %s45_s8, 1024  ;;  %p412_p11 = scmp.lt.s32.totalorder %s45_s8, %s45_s8 }
  0x1d   :  { %p408_p10 = scmp.ne.s32.totalorder %s45_s8, %s407_s1  ;;  %p413_p12 = scmp.lt.s32.totalorder %s407_s1, %s407_s1 }
  0x1f   :  { %p414_p13 = por %p413_p12, %p412_p11 }
  0x21   :  { %p415_p0 = pnand %p414_p13, %p408_p10 }
  0x23   :  { %418 = shalt.err (!%p415_p0)
}
  0x24   :  { %50 = dma.hbm_to_vmem [thread:$0]  %s515_s3, 1024, %s45_s8, [#allocation6], %s446_s21, %s446_s21, %s447_s22  }
  0x25   :  { %439 = dma.done.wait [#allocation3], 256  }
  0x26   :  { %440 = vsyncadd [#allocation3], 4294967040 }
  0x27   :  { %441 = dma.done.wait [#allocation6], 1280  }
  0x28   :  { %442 = vsyncadd [#allocation6], 4294966016  ;;  %v452_v0 = vmov 0.0   ;;  %vm453_vm0 = vmmov 0   ;;  %v349_v1 = vld [vmem:[#allocation5 + $0x8] sm:$0xff]   ;;  %v350_v2 = vld [vmem:[#allocation5] sm:$0xff]  }
  0x29   :  { %311 = vmatprep.subr.bf16.mxu0 %v452_v0  ;;  %315 = vmatprep.mubr.msk.bf16.mxu0 %vm453_vm0, %v452_v0  ;;  %v63_v3 = vld [vmem:[#allocation2] sm:$0xff]  ;;  %v64_v4 = vld [vmem:[#allocation2 + $0x8] sm:$0xff]  ;;  %v351_v5 = vld [vmem:[#allocation7 + $0x38] sm:$0xff]   ;;  %vm89_vm1 = vcmask 261120   ;;  %s454_s13 = smov [#allocation8]  }
  0x2a   :  { %319 = vmatprep.subr.bf16.mxu1 %v452_v0  ;;  %335 = vmatprep.mubr.msk.bf16.mxu1 %vm453_vm0, %v452_v0  ;;  %v65_v6 = vpack.c.bf16 %v64_v4, %v63_v3  ;;  %v352_v7 = vld [vmem:[#allocation7 + $0x30] sm:$0xff]   ;;  %v353_v8 = vld [vmem:[#allocation7 + $0x28] sm:$0xff]   ;;  %v354_v9 = vld [vmem:[#allocation7 + $0x20] sm:$0xff]   ;;  %s264_s14 = sshll.u32 %s454_s13, 4  ;;  %s265_s14 = int_to_ptr.vmem [resolvable:$true] %s264_s14 }
  0x2b   :  { %312 = vmatpush3.bf16.msra.mxu0 %v349_v1  ;;  %320 = vmatpush3.bf16.msra.mxu1 %v351_v5  ;;  %v355_v10 = vld [vmem:[#allocation7 + $0x18] sm:$0xff]   ;;  %v356_v11 = vld [vmem:[#allocation7 + $0x10] sm:$0xff]   ;;  %v357_v12 = vld [vmem:[#allocation7 + $0x8] sm:$0xff]   ;;  %p424_p2 = scmp.lt.s32.totalorder %s265_s14, %s265_s14 }
  0x2c   :  { %313 = vmatprep.subr.bf16.mxu0 %v452_v0  ;;  %321 = vmatprep.subr.bf16.mxu1 %v452_v0  ;;  %v358_v13 = vld [vmem:[#allocation7] sm:$0xff]  }
  0x2d   :  { %v277_v14 = vld [vmem:[%s514_s2] ss:$0 sm:$0xff]  ;;  %s419_s2 = scalar_lea.vmem %s265_s14, 128 }
  0x2e   :  { %v281_v25 = vld [vmem:[%s516_s4] ss:$0 sm:$0xff]  ;;  %p420_p1 = scmp.ne.s32.totalorder %s265_s14, %s419_s2  ;;  %p425_p3 = scmp.lt.s32.totalorder %s419_s2, %s419_s2 }
  0x2f   :  { %314 = vmatpush3.bf16.msra.mxu0 %v350_v2  ;;  %322 = vmatpush3.bf16.msra.mxu1 %v352_v7 }
  0x30   :  { %323 = vmatprep.subr.bf16.mxu1 %v452_v0  ;;  %p426_p4 = por %p425_p3, %p424_p2 }
  0x32   :  { %316 = vmatmul.mubr.msk.bf16.vlgmr.msra.gmra.mxu0 %vm89_vm1, %v65_v6  ;;  %p427_p5 = pnand %p426_p4, %p420_p1 }
  0x33   :  { %324 = vmatpush3.bf16.msra.mxu1 %v353_v8 }
  0x34   :  { %325 = vmatprep.subr.bf16.mxu1 %v452_v0 }
  0x37   :  { %326 = vmatpush3.bf16.msra.mxu1 %v354_v9 }
  0x38   :  { %327 = vmatprep.subr.bf16.mxu1 %v452_v0 }
  0x3b   :  { %328 = vmatpush3.bf16.msra.mxu1 %v355_v10 }
  0x3c   :  { %329 = vmatprep.subr.bf16.mxu1 %v452_v0 }
  0x3f   :  { %330 = vmatpush3.bf16.msra.mxu1 %v356_v11 }
  0x40   :  { %331 = vmatprep.subr.bf16.mxu1 %v452_v0 }
  0x43   :  { %332 = vmatpush3.bf16.msra.mxu1 %v357_v12 }
  0x44   :  { %333 = vmatprep.subr.bf16.mxu1 %v452_v0 }
  0x47   :  { %334 = vmatpush3.bf16.msra.mxu1 %v358_v13 }
  0xf2   :  { %v127_v15 = vpop.f32.mrf.mxu0 }
  0xf3   :  { %v128_v17 = vadd.f32 %v277_v14, %v127_v15 }
  0xf4   :  { %v317_v16 = vpop.f32.mrf.mxu0 }
  0xf5   :  { %v134_v21 = vmax.f32 %v128_v17, 0.0 }
  0xf6   :  { %v130_v18 = vpop.f32.mrf.mxu0 }
  0xf7   :  { %v131_v19 = vadd.f32 %v277_v14, %v130_v18 }
  0xf8   :  { %v318_v20 = vpop.f32.mrf.mxu0 }
  0xf9   :  { %v135_v22 = vmax.f32 %v131_v19, 0.0 }
  0xfb   :  { %v136_v23 = vpack.c.bf16 %v135_v22, %v134_v21 }
  0xfd   :  { %336 = vmatmul.mubr.bf16.vlgmr.msra.gmra.mxu1 %v136_v23 }
 0x1bd   :  { %v242_v24 = vpop.f32.mrf.mxu1 }
 0x1be   :  { %v243_v28 = vadd.f32 %v281_v25, %v242_v24 }
 0x1bf   :  { %v337_v26 = vpop.f32.mrf.mxu1 }
 0x1c1   :  { %v245_v27 = vpop.f32.mrf.mxu1 }
 0x1c2   :  { %v246_v29 = vadd.f32 %v281_v25, %v245_v27 }
 0x1c3   :  { %v338_v30 = vpop.f32.mrf.mxu1 }
 0x1c4   :  { %v297_v31 = vpack.c.bf16 %v246_v29, %v243_v28 }
 0x1c6   :  { %298 = vst [vmem:[#allocation8] sm:$0xff] %v297_v31  }
 0x1c7   :  { %430 = shalt.err (!%p427_p5)
}
 0x1c8   :  { %270 = dma.vmem_to_hbm [thread:$0]  %s265_s14, 128, %s517_s5, [#allocation4], %s446_s21, %s446_s21, %s447_s22  }
 0x1c9   :  { %443 = dma.done.wait [#allocation4], 128  }
 0x1ca   :  { %444 = vsyncadd [#allocation4], 4294967168 }
 0x1cb   :  { %274 = vsyncpa [#allocation3], 1 }
 0x1cc   :  { %275 = vsyncpa [#allocation6], 1 }
 0x1cd   :  { %276 = vsyncpa [#allocation4], 1 }

// kernel: _mlp_forward_impl.1
= control target key start
LH: loop header
LB: loop body
LE: loop exit
PB: predicated region body
PF: predicated region fallthrough
CT: control target
= control target key end

     0   :  { %10 = vsyncpa [#allocation3], 0  ;;  %s512_s0 = inlined_call_operand.hbm [shape: f32[16,32], index: 0, kind: input, shape index: {}]   ;;  %s513_s1 = inlined_call_operand.hbm [shape: bf16[32,128], index: 1, kind: input, shape index: {}]   ;;  %s514_s2 = inlined_call_operand.vmem [shape: f32[1,128], index: 2, kind: input, shape index: {}]   ;;  %s515_s3 = inlined_call_operand.hbm [shape: bf16[128,128], index: 3, kind: input, shape index: {}]   ;;  %s516_s4 = inlined_call_operand.vmem [shape: f32[1,128], index: 4, kind: input, shape index: {}]   ;;  %s517_s5 = inlined_call_operand.hbm [shape: bf16[16,128], index: 5, kind: output, shape index: {}]  }
   0x1   :  { %11 = vsyncpa [#allocation6], 0 }
   0x2   :  { %12 = vsyncpa [#allocation4], 0  ;;  %s445_s18 = smov [#allocation5]  }
   0x3   :  { %s30_s19 = sshll.u32 %s445_s18, 4  ;;  %s31_s19 = int_to_ptr.vmem [resolvable:$true] %s30_s19 }
   0x4   :  { %s367_s20 = scalar_lea.vmem %s31_s19, 256  ;;  %p372_p1 = scmp.lt.s32.totalorder %s31_s19, %s31_s19 }
   0x5   :  { %p368_p0 = scmp.ne.s32.totalorder %s31_s19, %s367_s20  ;;  %p373_p2 = scmp.lt.s32.totalorder %s367_s20, %s367_s20 }
   0x7   :  { %p374_p3 = por %p373_p2, %p372_p1 }
   0x9   :  { %p375_p4 = pnand %p374_p3, %p368_p0 }
   0xb   :  { %378 = shalt.err (!%p375_p4)
}
   0xc   :  { %s446_s21 = smov 64   ;;  %s447_s22 = smov 4  }
   0xd   :  { %36 = dma.hbm_to_vmem [thread:$0]  %s513_s1, 256, %s31_s19, [#allocation6], %s446_s21, %s446_s21, %s447_s22  }
   0xe   :  { %s448_s25 = smov [#allocation2]  }
   0xf   :  { %s18_s26 = sshll.u32 %s448_s25, 4  ;;  %s19_s26 = int_to_ptr.vmem [resolvable:$true] %s18_s26 }
  0x10   :  { %s387_s27 = scalar_lea.vmem %s19_s26, 256  ;;  %p392_p6 = scmp.lt.s32.totalorder %s19_s26, %s19_s26 }
  0x11   :  { %p388_p5 = scmp.ne.s32.totalorder %s19_s26, %s387_s27  ;;  %p393_p7 = scmp.lt.s32.totalorder %s387_s27, %s387_s27 }
  0x13   :  { %p394_p8 = por %p393_p7, %p392_p6 }
  0x15   :  { %p395_p9 = pnand %p394_p8, %p388_p5 }
  0x17   :  { %398 = shalt.err (!%p395_p9)
}
  0x18   :  { %s449_s28 = smov 128   ;;  %s450_s29 = smov 8  }
  0x19   :  { %24 = dma.hbm_to_vmem [thread:$0]  %s512_s0, 256, %s19_s26, [#allocation3], %s449_s28, %s449_s28, %s450_s29  }
  0x1a   :  { %s451_s7 = smov [#allocation7]  }
  0x1b   :  { %s44_s8 = sshll.u32 %s451_s7, 4  ;;  %s45_s8 = int_to_ptr.vmem [resolvable:$true] %s44_s8 }
  0x1c   :  { %s407_s1 = scalar_lea.vmem %s45_s8, 1024  ;;  %p412_p11 = scmp.lt.s32.totalorder %s45_s8, %s45_s8 }
  0x1d   :  { %p408_p10 = scmp.ne.s32.totalorder %s45_s8, %s407_s1  ;;  %p413_p12 = scmp.lt.s32.totalorder %s407_s1, %s407_s1 }
  0x1f   :  { %p414_p13 = por %p413_p12, %p412_p11 }
  0x21   :  { %p415_p0 = pnand %p414_p13, %p408_p10 }
  0x23   :  { %418 = shalt.err (!%p415_p0)
}
  0x24   :  { %50 = dma.hbm_to_vmem [thread:$0]  %s515_s3, 1024, %s45_s8, [#allocation6], %s446_s21, %s446_s21, %s447_s22  }
  0x25   :  { %439 = dma.done.wait [#allocation3], 256  }
  0x26   :  { %440 = vsyncadd [#allocation3], 4294967040 }
  0x27   :  { %441 = dma.done.wait [#allocation6], 1280  }
  0x28   :  { %442 = vsyncadd [#allocation6], 4294966016  ;;  %v452_v0 = vmov 0.0   ;;  %vm453_vm0 = vmmov 0   ;;  %v349_v1 = vld [vmem:[#allocation5 + $0x8] sm:$0xff]   ;;  %v350_v2 = vld [vmem:[#allocation5] sm:$0xff]  }
  0x29   :  { %311 = vmatprep.subr.bf16.mxu0 %v452_v0  ;;  %315 = vmatprep.mubr.msk.bf16.mxu0 %vm453_vm0, %v452_v0  ;;  %v63_v3 = vld [vmem:[#allocation2] sm:$0xff]  ;;  %v64_v4 = vld [vmem:[#allocation2 + $0x8] sm:$0xff]  ;;  %v351_v5 = vld [vmem:[#allocation7 + $0x38] sm:$0xff]   ;;  %vm89_vm1 = vcmask 261120   ;;  %s454_s13 = smov [#allocation8]  }
  0x2a   :  { %319 = vmatprep.subr.bf16.mxu1 %v452_v0  ;;  %335 = vmatprep.mubr.msk.bf16.mxu1 %vm453_vm0, %v452_v0  ;;  %v65_v6 = vpack.c.bf16 %v64_v4, %v63_v3  ;;  %v352_v7 = vld [vmem:[#allocation7 + $0x30] sm:$0xff]   ;;  %v353_v8 = vld [vmem:[#allocation7 + $0x28] sm:$0xff]   ;;  %v354_v9 = vld [vmem:[#allocation7 + $0x20] sm:$0xff]   ;;  %s264_s14 = sshll.u32 %s454_s13, 4  ;;  %s265_s14 = int_to_ptr.vmem [resolvable:$true] %s264_s14 }
  0x2b   :  { %312 = vmatpush3.bf16.msra.mxu0 %v349_v1  ;;  %320 = vmatpush3.bf16.msra.mxu1 %v351_v5  ;;  %v355_v10 = vld [vmem:[#allocation7 + $0x18] sm:$0xff]   ;;  %v356_v11 = vld [vmem:[#allocation7 + $0x10] sm:$0xff]   ;;  %v357_v12 = vld [vmem:[#allocation7 + $0x8] sm:$0xff]   ;;  %p424_p2 = scmp.lt.s32.totalorder %s265_s14, %s265_s14 }
  0x2c   :  { %313 = vmatprep.subr.bf16.mxu0 %v452_v0  ;;  %321 = vmatprep.subr.bf16.mxu1 %v452_v0  ;;  %v358_v13 = vld [vmem:[#allocation7] sm:$0xff]  }
  0x2d   :  { %v277_v14 = vld [vmem:[%s514_s2] ss:$0 sm:$0xff]  ;;  %s419_s2 = scalar_lea.vmem %s265_s14, 128 }
  0x2e   :  { %v281_v25 = vld [vmem:[%s516_s4] ss:$0 sm:$0xff]  ;;  %p420_p1 = scmp.ne.s32.totalorder %s265_s14, %s419_s2  ;;  %p425_p3 = scmp.lt.s32.totalorder %s419_s2, %s419_s2 }
  0x2f   :  { %314 = vmatpush3.bf16.msra.mxu0 %v350_v2  ;;  %322 = vmatpush3.bf16.msra.mxu1 %v352_v7 }
  0x30   :  { %323 = vmatprep.subr.bf16.mxu1 %v452_v0  ;;  %p426_p4 = por %p425_p3, %p424_p2 }
  0x32   :  { %316 = vmatmul.mubr.msk.bf16.vlgmr.msra.gmra.mxu0 %vm89_vm1, %v65_v6  ;;  %p427_p5 = pnand %p426_p4, %p420_p1 }
  0x33   :  { %324 = vmatpush3.bf16.msra.mxu1 %v353_v8 }
  0x34   :  { %325 = vmatprep.subr.bf16.mxu1 %v452_v0 }
  0x37   :  { %326 = vmatpush3.bf16.msra.mxu1 %v354_v9 }
  0x38   :  { %327 = vmatprep.subr.bf16.mxu1 %v452_v0 }
  0x3b   :  { %328 = vmatpush3.bf16.msra.mxu1 %v355_v10 }
  0x3c   :  { %329 = vmatprep.subr.bf16.mxu1 %v452_v0 }
  0x3f   :  { %330 = vmatpush3.bf16.msra.mxu1 %v356_v11 }
  0x40   :  { %331 = vmatprep.subr.bf16.mxu1 %v452_v0 }
  0x43   :  { %332 = vmatpush3.bf16.msra.mxu1 %v357_v12 }
  0x44   :  { %333 = vmatprep.subr.bf16.mxu1 %v452_v0 }
  0x47   :  { %334 = vmatpush3.bf16.msra.mxu1 %v358_v13 }
  0xf2   :  { %v127_v15 = vpop.f32.mrf.mxu0 }
  0xf3   :  { %v128_v17 = vadd.f32 %v277_v14, %v127_v15 }
  0xf4   :  { %v317_v16 = vpop.f32.mrf.mxu0 }
  0xf5   :  { %v134_v21 = vmax.f32 %v128_v17, 0.0 }
  0xf6   :  { %v130_v18 = vpop.f32.mrf.mxu0 }
  0xf7   :  { %v131_v19 = vadd.f32 %v277_v14, %v130_v18 }
  0xf8   :  { %v318_v20 = vpop.f32.mrf.mxu0 }
  0xf9   :  { %v135_v22 = vmax.f32 %v131_v19, 0.0 }
  0xfb   :  { %v136_v23 = vpack.c.bf16 %v135_v22, %v134_v21 }
  0xfd   :  { %336 = vmatmul.mubr.bf16.vlgmr.msra.gmra.mxu1 %v136_v23 }
 0x1bd   :  { %v242_v24 = vpop.f32.mrf.mxu1 }
 0x1be   :  { %v243_v28 = vadd.f32 %v281_v25, %v242_v24 }
 0x1bf   :  { %v337_v26 = vpop.f32.mrf.mxu1 }
 0x1c1   :  { %v245_v27 = vpop.f32.mrf.mxu1 }
 0x1c2   :  { %v246_v29 = vadd.f32 %v281_v25, %v245_v27 }
 0x1c3   :  { %v338_v30 = vpop.f32.mrf.mxu1 }
 0x1c4   :  { %v297_v31 = vpack.c.bf16 %v246_v29, %v243_v28 }
 0x1c6   :  { %298 = vst [vmem:[#allocation8] sm:$0xff] %v297_v31  }
 0x1c7   :  { %430 = shalt.err (!%p427_p5)
}
 0x1c8   :  { %270 = dma.vmem_to_hbm [thread:$0]  %s265_s14, 128, %s517_s5, [#allocation4], %s446_s21, %s446_s21, %s447_s22  }
 0x1c9   :  { %443 = dma.done.wait [#allocation4], 128  }
 0x1ca   :  { %444 = vsyncadd [#allocation4], 4294967168 }
 0x1cb   :  { %274 = vsyncpa [#allocation3], 1 }
 0x1cc   :  { %275 = vsyncpa [#allocation6], 1 }
 0x1cd   :  { %276 = vsyncpa [#allocation4], 1 }

</bundles_post_ra>
